<compile_context>
chip_gen: v7x
topology: tpu7x:2x2x1
jax: 0.10.0
libtpu: 0.0.40
codegen_flags: <defaults>
</compile_context>

<pallas_src>
import functools

import jax
import jax.numpy as jnp
from jax.experimental import pallas as pl
from jax.experimental.pallas import tpu as pltpu

_LANE = 512            # lane width of the flattened slab (multiple of 128)
_MAX_TILE_ROWS = 2048  # 2048 x 512 x 4B = 4 MiB per input block (f32)
_PAD_NEG = -1e30       # sentinel: softplus(-1e30 - 0) == 0 -> pads contribute 0


def _pairwise_ce_kernel(pos_ref, neg_ref, out_ref, acc_ref, *, inv_total):
    i = pl.program_id(0)

    @pl.when(i == 0)
    def _():
        acc_ref[...] = jnp.zeros_like(acc_ref)

    # Upcast after the load (inputs may be bf16); everything here is VPU/EUP.
    diff = neg_ref[...].astype(jnp.float32) - pos_ref[...].astype(jnp.float32)
    # Stable softplus: log(1 + exp(d)) = max(d, 0) + log(1 + exp(-|d|))
    sp = jnp.maximum(diff, 0.0) + jnp.log(1.0 + jnp.exp(-jnp.abs(diff)))

    # Fold row-groups into the persistent (8, LANE) accumulator with pure
    # elementwise vreg adds (no per-step cross-lane reduce).
    tb, lane = sp.shape
    acc_ref[...] += sp.reshape(tb // 8, 8, lane).sum(axis=0)

    @pl.when(i == pl.num_programs(0) - 1)
    def _():
        # Single cross-lane/sublane reduce at the very end, then the mean.
        out_ref[0, 0] = jnp.sum(acc_ref[...]) * jnp.float32(inv_total)


def pairwise_softmax_ce_loss(positives: jax.Array, negatives: jax.Array) -> jax.Array:
    assert positives.shape == negatives.shape
    assert positives.dtype == negatives.dtype
    total = positives.size
    assert total > 0

    itemsize = jnp.dtype(positives.dtype).itemsize
    sublane = max(8, 32 // itemsize)  # 8 for f32, 16 for bf16, 32 for int8/fp8

    pos = positives.reshape(-1)
    neg = negatives.reshape(-1)

    # Flatten to a lane-dense (rows, _LANE) slab; pick the biggest row tile
    # (sublane-aligned) up to ~4 MiB per input block.
    rows = pl.cdiv(total, _LANE)
    tb = min(_MAX_TILE_ROWS, ((rows + sublane - 1) // sublane) * sublane)
    rows_padded = ((rows + tb - 1) // tb) * tb
    padded_total = rows_padded * _LANE

    if padded_total != total:
        pad = padded_total - total
        # Padded pairs produce softplus(-1e30) == 0, so they add nothing;
        # the mean still divides by the true `total`.
        pos = jnp.pad(pos, (0, pad), constant_values=0.0)
        neg = jnp.pad(neg, (0, pad), constant_values=_PAD_NEG)

    pos2 = pos.reshape(rows_padded, _LANE)
    neg2 = neg.reshape(rows_padded, _LANE)
    grid = (rows_padded // tb,)

    out = pl.pallas_call(
        functools.partial(_pairwise_ce_kernel, inv_total=1.0 / float(total)),
        out_shape=jax.ShapeDtypeStruct((1, 1), jnp.float32),
        grid_spec=pltpu.PrefetchScalarGridSpec(
            num_scalar_prefetch=0,
            grid=grid,
            in_specs=[
                pl.BlockSpec((tb, _LANE), lambda i: (i, 0)),
                pl.BlockSpec((tb, _LANE), lambda i: (i, 0)),
            ],
            out_specs=pl.BlockSpec(
                (1, 1), lambda i: (0, 0), memory_space=pltpu.SMEM
            ),
            scratch_shapes=[pltpu.VMEM((8, _LANE), jnp.float32)],
        ),
        compiler_params=pltpu.CompilerParams(
            dimension_semantics=("arbitrary",),   # serial accumulation axis
            vmem_limit_bytes=48 * 1024 * 1024,    # 2 in x 2 buf x <=4 MiB + slack; v7x-safe
        ),
    )(pos2, neg2)

    return out[0, 0]  # scalar, matches torch .mean()


def _reference(positives, negatives):
    # Numerically-stable reference for log(1 + exp(neg - pos)).mean()
    return jnp.mean(jnp.logaddexp(0.0, negatives.astype(jnp.float32)
                                  - positives.astype(jnp.float32)))


if __name__ == "__main__":
    key = jax.random.PRNGKey(0)

    # Case 1: lane/sublane aligned shape.
    kp, kn, key = jax.random.split(key, 3)
    B, N = 16, 256
    positives = jax.random.normal(kp, (B, N), dtype=jnp.float32)
    negatives = jax.random.normal(kn, (B, N), dtype=jnp.float32)
    loss = pairwise_softmax_ce_loss(positives, negatives)
    jax.block_until_ready(loss)
    ref = _reference(positives, negatives)
    assert jnp.allclose(loss, ref, rtol=1e-5, atol=1e-5), (loss, ref)

    # Case 2: ragged shape (exercises the zero-loss padding path).
    kp2, kn2, key = jax.random.split(key, 3)
    B2, N2 = 5, 37
    positives2 = jax.random.normal(kp2, (B2, N2), dtype=jnp.float32)
    negatives2 = jax.random.normal(kn2, (B2, N2), dtype=jnp.float32)
    loss2 = pairwise_softmax_ce_loss(positives2, negatives2)
    jax.block_until_ready(loss2)
    ref2 = _reference(positives2, negatives2)
    assert jnp.allclose(loss2, ref2, rtol=1e-5, atol=1e-5), (loss2, ref2)

    # Case 3: bf16 inputs (native-dtype ingest, 16-row sublane tiling).
    kp3, kn3 = jax.random.split(key)
    B3, N3 = 32, 512
    positives3 = jax.random.normal(kp3, (B3, N3), dtype=jnp.bfloat16)
    negatives3 = jax.random.normal(kn3, (B3, N3), dtype=jnp.bfloat16)
    loss3 = pairwise_softmax_ce_loss(positives3, negatives3)
    jax.block_until_ready(loss3)
    ref3 = _reference(positives3, negatives3)
    assert jnp.allclose(loss3, ref3, rtol=1e-4, atol=1e-4), (loss3, ref3)

    print("KERNEL_OK")
</pallas_src>

<mosaic_0001>
module attributes {stable_mosaic.version = 11 : i64} {
  func.func @_pairwise_ce_kernel(%arg0: i32, %arg1: memref<8x512xf32, #tpu.memory_space<vmem>>, %arg2: memref<8x512xf32, #tpu.memory_space<vmem>>, %arg3: memref<1x1xf32, #tpu.memory_space<smem>>, %arg4: memref<8x512xf32, #tpu.memory_space<vmem>>) attributes {dimension_semantics = [#tpu.dimension_semantics<arbitrary>], iteration_bounds = array<i64: 1>, scalar_prefetch = 0 : i64, scratch_operands = 1 : i64, tpu.core_type = #tpu.core_type<tc>, window_params = [{transform_indices = @transform_0, window_bounds = array<i64: 8, 512>}, {transform_indices = @transform_1, window_bounds = array<i64: 8, 512>}, {transform_indices = @transform_2, window_bounds = array<i64: 1, 1>}]} {
    %c0_i32 = arith.constant 0 : i32
    %0 = arith.cmpi eq, %arg0, %c0_i32 : i32
    %1 = arith.extui %0 : i1 to i32
    %c0_i32_0 = arith.constant 0 : i32
    %2 = arith.cmpi ne, %1, %c0_i32_0 : i32
    scf.if %2 {
      %cst_13 = arith.constant 0.000000e+00 : f32
      %24 = vector.broadcast %cst_13 : f32 to vector<8x512xf32>
      %c0_14 = arith.constant 0 : index
      %c0_15 = arith.constant 0 : index
      %25 = vector.load %arg4[%c0_14, %c0_15] : memref<8x512xf32, #tpu.memory_space<vmem>>, vector<8x512xf32>
      tpu.vector_store %arg4[%c0_14, %c0_15], %24 {strides = array<i32>} : memref<8x512xf32, #tpu.memory_space<vmem>>, vector<8x512xf32>,
    } else {
    }
    %c0 = arith.constant 0 : index
    %c0_1 = arith.constant 0 : index
    %3 = vector.load %arg2[%c0, %c0_1] : memref<8x512xf32, #tpu.memory_space<vmem>>, vector<8x512xf32>
    %c0_2 = arith.constant 0 : index
    %c0_3 = arith.constant 0 : index
    %4 = vector.load %arg1[%c0_2, %c0_3] : memref<8x512xf32, #tpu.memory_space<vmem>>, vector<8x512xf32>
    %5 = arith.subf %3, %4 : vector<8x512xf32>
    %cst = arith.constant 0.000000e+00 : f32
    %6 = vector.broadcast %cst : f32 to vector<8x512xf32>
    %7 = arith.maximumf %5, %6 : vector<8x512xf32>
    %8 = math.absf %5 : vector<8x512xf32>
    %cst_4 = arith.constant 0.000000e+00 : f32
    %9 = vector.broadcast %cst_4 : f32 to vector<8x512xf32>
    %10 = arith.subf %9, %8 : vector<8x512xf32>
    %11 = math.exp %10 : vector<8x512xf32>
    %cst_5 = arith.constant 1.000000e+00 : f32
    %12 = vector.broadcast %cst_5 : f32 to vector<8x512xf32>
    %13 = arith.addf %12, %11 : vector<8x512xf32>
    %14 = math.log %13 : vector<8x512xf32>
    %15 = arith.addf %7, %14 : vector<8x512xf32>
    %c0_6 = arith.constant 0 : index
    %c0_7 = arith.constant 0 : index
    %16 = vector.load %arg4[%c0_6, %c0_7] : memref<8x512xf32, #tpu.memory_space<vmem>>, vector<8x512xf32>
    %17 = vector.shape_cast %15 : vector<8x512xf32> to vector<1x8x512xf32>
    %cst_8 = arith.constant dense<0.000000e+00> : vector<8x512xf32>
    %18 = vector.multi_reduction <add>, %17, %cst_8 [0] : vector<1x8x512xf32> to vector<8x512xf32>
    %19 = arith.addf %16, %18 : vector<8x512xf32>
    %c0_9 = arith.constant 0 : index
    %c0_10 = arith.constant 0 : index
    %20 = vector.load %arg4[%c0_9, %c0_10] : memref<8x512xf32, #tpu.memory_space<vmem>>, vector<8x512xf32>
    tpu.vector_store %arg4[%c0_9, %c0_10], %19 {strides = array<i32>} : memref<8x512xf32, #tpu.memory_space<vmem>>, vector<8x512xf32>,
    %c0_i32_11 = arith.constant 0 : i32
    %21 = arith.cmpi eq, %arg0, %c0_i32_11 : i32
    %22 = arith.extui %21 : i1 to i32
    %c0_i32_12 = arith.constant 0 : i32
    %23 = arith.cmpi ne, %22, %c0_i32_12 : i32
    scf.if %23 {
      %c0_13 = arith.constant 0 : index
      %c0_14 = arith.constant 0 : index
      %24 = vector.load %arg4[%c0_13, %c0_14] : memref<8x512xf32, #tpu.memory_space<vmem>>, vector<8x512xf32>
      %25 = vector.shape_cast %24 : vector<8x512xf32> to vector<1x8x512xf32>
      %cst_15 = arith.constant dense<0.000000e+00> : vector<1xf32>
      %26 = vector.multi_reduction <add>, %25, %cst_15 [1, 2] : vector<1x8x512xf32> to vector<1xf32>
      %27 = vector.shape_cast %26 : vector<1xf32> to vector<1x1x1xf32>
      %28 = vector.extract %27[0, 0, 0] : f32 from vector<1x1x1xf32>
      %cst_16 = arith.constant 2.44140625E-4 : f32
      %29 = arith.mulf %28, %cst_16 : f32
      %c0_17 = arith.constant 0 : index
      %c0_18 = arith.constant 0 : index
      %30 = memref.load %arg3[%c0_17, %c0_18] : memref<1x1xf32, #tpu.memory_space<smem>>
      memref.store %29, %arg3[%c0_17, %c0_18] : memref<1x1xf32, #tpu.memory_space<smem>>
    } else {
    }
    return
  }
  func.func @transform_0(%arg0: i32) -> (i32, i32) {
    %c0_i32 = arith.constant 0 : i32
    %c0_i32_0 = arith.constant 0 : i32
    return %arg0, %c0_i32 : i32, i32
  }
  func.func @transform_1(%arg0: i32) -> (i32, i32) {
    %c0_i32 = arith.constant 0 : i32
    %c0_i32_0 = arith.constant 0 : i32
    return %arg0, %c0_i32 : i32, i32
  }
  func.func @transform_2(%arg0: i32) -> (i32, i32) {
    %c0_i32 = arith.constant 0 : i32
    %c0_i32_0 = arith.constant 0 : i32
    %c0_i32_1 = arith.constant 0 : i32
    return %c0_i32, %c0_i32_0 : i32, i32
  }
}

</mosaic_0001>

<bundles_post_ra>
// kernel: tpu_custom_call.1
= control target key start
LH: loop header
LB: loop body
LE: loop exit
PB: predicated region body
PF: predicated region fallthrough
CT: control target
= control target key end

     0   :  { %7 = vsyncpa [#allocation4], 0  ;;  %s280_s0 = inlined_call_operand.hbm [shape: f32[8,512], index: 0, kind: input, shape index: {}]   ;;  %s281_s1 = inlined_call_operand.hbm [shape: f32[8,512], index: 1, kind: input, shape index: {}]   ;;  %s282_s2 = inlined_call_operand.hbm [shape: f32[1,1], index: 2, kind: output, shape index: {}]  }
   0x1   :  { %8 = vsyncpa [#allocation7], 0 }
   0x2   :  { %9 = vsyncpa [#allocation5], 0  ;;  %s226_s9 = smov [#allocation3]   ;;  %s227_s11 = smov [#allocation6]  }
   0x3   :  { %s16_s10 = sshll.u32 %s226_s9, 4  ;;  %s26_s12 = sshll.u32 %s227_s11, 4  ;;  %s17_s10 = int_to_ptr.vmem [resolvable:$true] %s16_s10  ;;  %s27_s12 = int_to_ptr.vmem [resolvable:$true] %s26_s12 }
   0x4   :  { %s166_s15 = scalar_lea.hbm %s280_s0, 512 }
   0x5   :  { %p167_p0 = scmp.ne.s32.totalorder %s280_s0, %s166_s15  ;;  %p170_p1 = scmp.lt.u32.totalorder %s166_s15, %s280_s0 }
   0x7   :  { %p172_p2 = pnand %p170_p1, %p167_p0 }
   0x9   :  { %175 = shalt.err (!%p172_p2)
}
   0xa   :  { %s176_s20 = scalar_lea.vmem %s17_s10, 512  ;;  %p181_p4 = scmp.lt.s32.totalorder %s17_s10, %s17_s10 }
   0xb   :  { %p177_p3 = scmp.ne.s32.totalorder %s17_s10, %s176_s20  ;;  %p182_p5 = scmp.lt.s32.totalorder %s176_s20, %s176_s20 }
   0xd   :  { %p183_p6 = por %p182_p5, %p181_p4 }
   0xf   :  { %p184_p7 = pnand %p183_p6, %p177_p3 }
  0x11   :  { %187 = shalt.err (!%p184_p7)
}
  0x12   :  { %19 = dma.hbm_to_vmem [thread:$0]  %s280_s0, 512, %s17_s10, [#allocation4]  }
  0x13   :  { %s188_s25 = scalar_lea.hbm %s281_s1, 512 }
  0x14   :  { %p189_p8 = scmp.ne.s32.totalorder %s281_s1, %s188_s25  ;;  %p192_p9 = scmp.lt.u32.totalorder %s188_s25, %s281_s1 }
  0x16   :  { %p194_p10 = pnand %p192_p9, %p189_p8 }
  0x18   :  { %197 = shalt.err (!%p194_p10)
}
  0x19   :  { %s198_s30 = scalar_lea.vmem %s27_s12, 512  ;;  %p203_p12 = scmp.lt.s32.totalorder %s27_s12, %s27_s12 }
  0x1a   :  { %p199_p11 = scmp.ne.s32.totalorder %s27_s12, %s198_s30  ;;  %p204_p13 = scmp.lt.s32.totalorder %s198_s30, %s198_s30 }
  0x1c   :  { %p205_p0 = por %p204_p13, %p203_p12 }
  0x1e   :  { %p206_p1 = pnand %p205_p0, %p199_p11 }
  0x20   :  { %209 = shalt.err (!%p206_p1)
}
  0x21   :  { %29 = dma.hbm_to_vmem [thread:$0]  %s281_s1, 512, %s27_s12, [#allocation7]  }
  0x22   :  { %220 = dma.done.wait [#allocation4], 512  }
  0x23   :  { %221 = vsyncadd [#allocation4], 4294966784 }
  0x24   :  { %222 = dma.done.wait [#allocation7], 512  }
  0x25   :  { %223 = vsyncadd [#allocation7], 4294966784  ;;  %v44_v0 = vld [vmem:[#allocation6] sm:$0xff]  ;;  %v45_v1 = vld [vmem:[#allocation6 + $0x8] sm:$0xff]  ;;  %s210_s7 = scalar_lea.hbm %s282_s2, 16 }
  0x26   :  { %v46_v2 = vld [vmem:[#allocation6 + $0x10] sm:$0xff]  ;;  %v47_v3 = vld [vmem:[#allocation6 + $0x18] sm:$0xff]  ;;  %v48_v4 = vld [vmem:[#allocation3] sm:$0xff]  ;;  %p211_p2 = scmp.ne.s32.totalorder %s282_s2, %s210_s7  ;;  %p214_p3 = scmp.lt.u32.totalorder %s210_s7, %s282_s2 }
  0x27   :  { %v49_v5 = vld [vmem:[#allocation3 + $0x8] sm:$0xff]  ;;  %v50_v6 = vld [vmem:[#allocation3 + $0x10] sm:$0xff]  ;;  %v51_v7 = vld [vmem:[#allocation3 + $0x18] sm:$0xff]  ;;  %v52_v8 = vsub.f32 %v44_v0, %v48_v4 }
  0x28   :  { %v53_v9 = vsub.f32 %v45_v1, %v49_v5  ;;  %v54_v10 = vsub.f32 %v46_v2, %v50_v6  ;;  %v55_v11 = vsub.f32 %v47_v3, %v51_v7  ;;  %p216_p4 = pnand %p214_p3, %p211_p2 }
  0x29   :  { %v60_v12 = vand.u32 2147483647, %v52_v8  ;;  %v56_v32 = vmax.f32 %v52_v8, 0.0 }
  0x2a   :  { %v61_v13 = vand.u32 2147483647, %v53_v9  ;;  %v62_v14 = vand.u32 2147483647, %v54_v10  ;;  %v63_v15 = vand.u32 2147483647, %v55_v11 }
  0x2b   :  { %v64_v16 = vsub.f32 0.0, %v60_v12  ;;  %v57_v34 = vmax.f32 %v53_v9, 0.0  ;;  %v58_v36 = vmax.f32 %v54_v10, 0.0  ;;  %v59_v39 = vmax.f32 %v55_v11, 0.0 }
  0x2c   :  { %v65_v17 = vsub.f32 0.0, %v61_v13  ;;  %v66_v18 = vsub.f32 0.0, %v62_v14  ;;  %v67_v19 = vsub.f32 0.0, %v63_v15 }
  0x2d   :  { %v68_v20 = vmul.f32 1.442695, %v64_v16 }
  0x2e   :  { %v70_v21 = vmul.f32 1.442695, %v65_v17  ;;  %v72_v22 = vmul.f32 1.442695, %v66_v18  ;;  %v74_v23 = vmul.f32 1.442695, %v67_v19 }
  0x2f   :  { %150 = vpow2.f32 %v68_v20 }
  0x30   :  { %152 = vpow2.f32 %v70_v21 }
  0x31   :  { %154 = vpow2.f32 %v72_v22 }
  0x32   :  { %156 = vpow2.f32 %v74_v23 }
  0x39   :  { %v151_v24 = vpop.eup %150 }
  0x3a   :  { %v153_v25 = vpop.eup %152  ;;  %v76_v26 = vadd.f32 1.0, %v151_v24 }
  0x3b   :  { %v155_v27 = vpop.eup %154  ;;  %v77_v28 = vadd.f32 1.0, %v153_v25 }
  0x3c   :  { %v157_v29 = vpop.eup %156  ;;  %v78_v30 = vadd.f32 1.0, %v155_v27  ;;  %158 = vlog2.f32 %v76_v26 }
  0x3d   :  { %v79_v31 = vadd.f32 1.0, %v157_v29  ;;  %160 = vlog2.f32 %v77_v28 }
  0x3e   :  { %162 = vlog2.f32 %v78_v30 }
  0x3f   :  { %164 = vlog2.f32 %v79_v31 }
  0x46   :  { %v159_v33 = vpop.eup %158 }
  0x47   :  { %v161_v35 = vpop.eup %160  ;;  %v81_v37 = vmul.f32 0.6931472, %v159_v33 }
  0x48   :  { %v163_v38 = vpop.eup %162  ;;  %v83_v40 = vmul.f32 0.6931472, %v161_v35 }
  0x49   :  { %v165_v41 = vpop.eup %164  ;;  %v85_v42 = vmul.f32 0.6931472, %v163_v38  ;;  %v88_v43 = vadd.f32 %v81_v37, %v56_v32 }
  0x4a   :  { %v87_v44 = vmul.f32 0.6931472, %v165_v41  ;;  %v89_v45 = vadd.f32 %v83_v40, %v57_v34 }
  0x4b   :  { %v90_v46 = vadd.f32 %v85_v42, %v58_v36 }
  0x4c   :  { %v91_v47 = vadd.f32 %v87_v44, %v59_v39  ;;  %v115_v48 = vadd.f32 %v89_v45, %v88_v43 }
  0x4e   :  { %v116_v49 = vadd.f32 %v115_v48, %v90_v46 }
  0x50   :  { %v117_v50 = vadd.f32 %v116_v49, %v91_v47 }
  0x52   :  { %118 = vadd.xlane.f32.xlu0 %v117_v50 }
  0xdf   :  { %v119_v51 = vpop.xlane.xlu0 %118 }
  0xe0   :  { %v120_v52 = vrot.slane %v119_v51, 4 }
  0xe2   :  { %v121_v53 = vadd.f32 %v120_v52, %v119_v51 }
  0xe4   :  { %v122_v54 = vrot.slane %v121_v53, 2 }
  0xe6   :  { %v123_v55 = vadd.f32 %v122_v54, %v121_v53 }
  0xe8   :  { %v124_v56 = vrot.slane %v123_v55, 1 }
  0xea   :  { %v125_v57 = vadd.f32 %v124_v56, %v123_v55 }
  0xec   :  { %145 = vpush %v125_v57 }
 0x11d   :  { %s146_s1 = spop %145 }
 0x11e   :  { %s127_s4 = smul.f32 0.00024414063, %s146_s1 }
 0x120   :  { %129 = sst [smem:[#allocation8]] %s127_s4 }
 0x121   :  { %219 = shalt.err (!%p216_p4)
}
 0x122   :  { %s228_s12 = smov [#allocation8]  }
 0x123   :  { %137 = dma.smem_to_hbm %s228_s12, 16, %s282_s2, [#allocation5]  }
 0x124   :  { %224 = dma.done.wait [#allocation5], 16  }
 0x125   :  { %225 = vsyncadd [#allocation5], 4294967280 }
 0x126   :  { %141 = sfence }
 0x127   :  { %142 = vsyncpa [#allocation4], 1 }
 0x128   :  { %143 = vsyncpa [#allocation7], 1 }
 0x129   :  { %144 = vsyncpa [#allocation5], 1 }

</bundles_post_ra>
